<compile_context>
chip_gen: v6e
topology: v6e:2x2x1
jax: 0.10.0
libtpu: 0.0.40
codegen_flags: <defaults>
</compile_context>

<pallas_src>
import functools

import jax
import jax.numpy as jnp
import numpy as np
from jax import lax
from jax.experimental import pallas as pl
from jax.experimental.pallas import tpu as pltpu


def _apply_activation(y, activation):
    if activation == "relu":
        return jnp.maximum(y, 0.0)
    if activation == "sigmoid":
        return 1.0 / (1.0 + jnp.exp(-y))          # EUP exp + VPU; f32 epilogue (v5e-safe)
    if activation == "identity":
        return y
    raise ValueError(f"unsupported activation: {activation}")


def _deconv_gemm_kernel(p_ref, w_ref, b_ref, o_ref, *, activation):
    """One fused GEMM + bias + activation tile.

    p_ref: (KK, TM)    zero-free im2col patches, contraction-major (lanes = output pixels)
    w_ref: (NOUT, KK)  combined sub-pixel weight (NOUT = s*s*COUT)
    b_ref: (NOUT, 1)   f32 bias, broadcast over lanes
    o_ref: (NOUT, TM)  lane-dense output tile
    """
    # Single MXU push per tile; f32 accumulation regardless of operand dtype.
    acc = jnp.dot(w_ref[...], p_ref[...], preferred_element_type=jnp.float32)
    acc = acc + b_ref[...]
    # pre_activation_fn = identity, post_activation_fn = identity in the module.
    acc = _apply_activation(acc, activation)
    o_ref[...] = acc.astype(o_ref.dtype)


def _subpixel_geometry(K, s, p):
    """Input-pixel tap offsets (relative to the output-phase base pixel)."""
    omin = -((K - 1 - p) // s)
    omax = (s - 1 + p) // s
    Tc = omax - omin + 1
    return omin, omax, Tc


def _build_subpixel_weight(weight, *, K, s, p, Tc, omin):
    """ConvTranspose2d weight (CIN, COUT, K, K) -> combined sub-pixel GEMM weight
    (s*s*COUT, Tc*Tc*CIN).  Row = (rh, rw, co); col = (th, tw, ci).  Output phase
    (rh, rw) at tap (th, tw) uses kernel element kh = rh + p - s*(omin + th)
    (zero if out of [0, K))."""
    CIN, COUT = weight.shape[0], weight.shape[1]
    r = np.arange(s)[:, None]
    t = np.arange(Tc)[None, :]
    k_idx = r + p - s * (omin + t)                     # (s, Tc), static numpy
    valid = (k_idx >= 0) & (k_idx < K)
    k_clip = np.clip(k_idx, 0, K - 1)
    # gather -> (CIN, COUT, rh, th, rw, tw)
    wg = weight[:, :, k_clip[:, :, None, None], k_clip[None, None, :, :]]
    mask = valid[:, :, None, None] & valid[None, None, :, :]
    wg = wg * jnp.asarray(mask, wg.dtype)[None, None]
    # -> (rh, rw, co, th, tw, ci) -> (s*s*COUT, Tc*Tc*CIN)
    wg = jnp.transpose(wg, (2, 4, 1, 3, 5, 0))
    return wg.reshape(s * s * COUT, Tc * Tc * CIN)


def deconv_layer_forward(x_nchw, weight, bias, *, stride, padding,
                         activation="relu", compute_dtype=None, block_m=128):
    """PyTorch-equivalent DeConvLayer forward: ConvTranspose2d + activation.

    weight: (CIN, COUT, K, K) (nn.ConvTranspose2d layout), bias: (COUT,).
    compute_dtype=jnp.bfloat16 casts the GEMM operands only (f32 accumulate/epilogue).
    """
    N, CIN, H, W = x_nchw.shape
    CIN_w, COUT, K, K2 = weight.shape
    assert CIN_w == CIN and K == K2
    s, p = int(stride), int(padding)
    assert K - 1 - p >= 0, "kernel_size - 1 - padding must be >= 0"
    # output_padding / dilation / groups of ConvTranspose2d are not supported (module defaults).
    HO = (H - 1) * s - 2 * p + K
    WO = (W - 1) * s - 2 * p + K
    HOm = (HO + s - 1) // s
    WOm = (WO + s - 1) // s
    omin, omax, Tc = _subpixel_geometry(K, s, p)
    KK = Tc * Tc * CIN
    NOUT = s * s * COUT
    out_dtype = x_nchw.dtype
    cdtype = out_dtype if compute_dtype is None else compute_dtype

    # ---------- wrapper-side layout plumbing: NHWC, halo pad, zero-free im2col ----------
    x = jnp.transpose(x_nchw, (0, 2, 3, 1))                       # NCHW -> NHWC
    pad_lo = -omin
    pad_hi_h = max(0, HOm + omax - H)
    pad_hi_w = max(0, WOm + omax - W)
    xp = jnp.pad(x, ((0, 0), (pad_lo, pad_hi_h), (pad_lo, pad_hi_w), (0, 0)))

    taps = []
    for th in range(Tc):
        for tw in range(Tc):
            taps.append(lax.slice(xp, (0, th, tw, 0),
                                  (N, th + HOm, tw + WOm, CIN)))
    patches = jnp.stack(taps, axis=3).reshape(N * HOm * WOm, KK)  # rows = (n, ah, aw)
    M = N * HOm * WOm
    Mpad = ((M + block_m - 1) // block_m) * block_m
    if Mpad != M:
        patches = jnp.pad(patches, ((0, Mpad - M), (0, 0)))       # extra rows discarded below
    patches_t = jnp.transpose(patches, (1, 0)).astype(cdtype)     # (KK, Mpad): lane-dense

    w_comb = _build_subpixel_weight(weight, K=K, s=s, p=p, Tc=Tc,
                                    omin=omin).astype(cdtype)     # (NOUT, KK)
    b_col = jnp.tile(bias.astype(jnp.float32), s * s).reshape(NOUT, 1)

    kernel = functools.partial(_deconv_gemm_kernel, activation=activation)
    # NOTE(v7x): for much larger H/W/CIN, additionally tile KK / raise block_m and set
    # pltpu.CompilerParams(vmem_limit_bytes=...) so double-buffered blocks fit 32 MiB.
    out_t = pl.pallas_call(
        kernel,
        out_shape=jax.ShapeDtypeStruct((NOUT, Mpad), out_dtype),
        grid_spec=pltpu.PrefetchScalarGridSpec(
            num_scalar_prefetch=0,
            grid=(Mpad // block_m,),
            in_specs=[
                pl.BlockSpec((KK, block_m), lambda i: (0, i)),    # patches tile
                pl.BlockSpec((NOUT, KK), lambda i: (0, 0)),       # combined weight
                pl.BlockSpec((NOUT, 1), lambda i: (0, 0)),        # bias column
            ],
            out_specs=pl.BlockSpec((NOUT, block_m), lambda i: (0, i)),
        ),
        compiler_params=pltpu.CompilerParams(
            dimension_semantics=("parallel",)),
    )(patches_t, w_comb, b_col)

    # ---------- pixel shuffle (depth-to-space) back to NCHW: layout plumbing ----------
    out = jnp.transpose(out_t, (1, 0))[:M]                        # (M, NOUT)
    out = out.reshape(N, HOm, WOm, s, s, COUT)
    out = jnp.transpose(out, (0, 1, 3, 2, 4, 5))
    out = out.reshape(N, HOm * s, WOm * s, COUT)[:, :HO, :WO, :]
    return jnp.transpose(out, (0, 3, 1, 2))                       # NHWC -> NCHW


def deconv2d_model_forward(x, layer_params, *, kernel_sizes, strides, paddings,
                           activations, compute_dtype=None):
    """PyTorch-equivalent DeConv2d_Model forward (stack of DeConvLayer kernels)."""
    if x.ndim == 3:
        x = x[None]
    for (w, b), k, s, p, act in zip(layer_params, kernel_sizes, strides,
                                    paddings, activations):
        assert w.shape[2] == k
        x = deconv_layer_forward(x, w, b, stride=s, padding=p, activation=act,
                                 compute_dtype=compute_dtype)
    return x


def _reference_deconv_layer(x_nchw, weight, bias, *, stride, padding, activation):
    """Pure-JAX reference matching torch.nn.ConvTranspose2d + activation."""
    K = weight.shape[2]
    w = jnp.transpose(weight, (1, 0, 2, 3))[:, :, ::-1, ::-1]     # (COUT, CIN, K, K)
    q = K - 1 - padding
    y = lax.conv_general_dilated(
        x_nchw, w, window_strides=(1, 1), padding=[(q, q), (q, q)],
        lhs_dilation=(stride, stride),
        dimension_numbers=("NCHW", "OIHW", "NCHW"),
        precision=lax.Precision.HIGHEST)
    y = y + bias.reshape(1, -1, 1, 1)
    return _apply_activation(y, activation)


if __name__ == "__main__":
    key = jax.random.PRNGKey(0)

    # --- 1) Single DeConvLayer(4 -> 8, K=4, s=2, p=1) + relu (shapes from the review) ---
    k1, k2, k3, key = jax.random.split(key, 4)
    N, CIN, H, W = 2, 4, 8, 8
    COUT, K, S, P = 8, 4, 2, 1
    x = jax.random.normal(k1, (N, CIN, H, W), dtype=jnp.float32)
    # nn.ConvTranspose2d weight layout: (in_channels, out_channels, kH, kW)
    w = 0.1 * jax.random.normal(k2, (CIN, COUT, K, K), dtype=jnp.float32)
    b = 0.1 * jax.random.normal(k3, (COUT,), dtype=jnp.float32)

    out = jax.block_until_ready(
        deconv_layer_forward(x, w, b, stride=S, padding=P, activation="relu"))
    ref = jax.block_until_ready(
        _reference_deconv_layer(x, w, b, stride=S, padding=P, activation="relu"))
    assert out.shape == (N, COUT, 16, 16)
    np.testing.assert_allclose(np.asarray(out), np.asarray(ref),
                               rtol=1e-4, atol=1e-4)

    # bf16 MXU operand path (v6e/v7x), f32 accumulation + f32 epilogue.
    out_bf16 = jax.block_until_ready(
        deconv_layer_forward(x, w, b, stride=S, padding=P, activation="relu",
                             compute_dtype=jnp.bfloat16))
    np.testing.assert_allclose(np.asarray(out_bf16), np.asarray(ref),
                               rtol=5e-2, atol=2e-2)

    # --- 2) Full DeConv2d_Model decoder stack: 64 -> [64, 32, 4], K=[3,4,8], s=[1,2,4] ---
    channels = [64, 32, 4]
    kernel_sizes = [3, 4, 8]
    strides = [1, 2, 4]
    paddings = [0, 0, 0]
    activations = ["relu", "relu", "sigmoid"]
    kx, key = jax.random.split(key)
    xd = jax.random.normal(kx, (2, 64, 4, 4), dtype=jnp.float32)
    params = []
    in_c = 64
    for c, ks in zip(channels, kernel_sizes):
        kw_key, kb_key, key = jax.random.split(key, 3)
        params.append((0.1 * jax.random.normal(kw_key, (in_c, c, ks, ks), jnp.float32),
                       0.1 * jax.random.normal(kb_key, (c,), jnp.float32)))
        in_c = c

    out_dec = jax.block_until_ready(
        deconv2d_model_forward(xd, params, kernel_sizes=kernel_sizes,
                               strides=strides, paddings=paddings,
                               activations=activations))
    ref_dec = xd
    for (w_l, b_l), s_l, p_l, a_l in zip(params, strides, paddings, activations):
        ref_dec = _reference_deconv_layer(ref_dec, w_l, b_l, stride=s_l,
                                          padding=p_l, activation=a_l)
    ref_dec = jax.block_until_ready(ref_dec)
    assert out_dec.shape == (2, 4, 60, 60)
    np.testing.assert_allclose(np.asarray(out_dec), np.asarray(ref_dec),
                               rtol=5e-4, atol=5e-4)

    print("KERNEL_OK")
</pallas_src>

<mosaic_0001>
module attributes {stable_mosaic.version = 11 : i64} {
  func.func @_deconv_gemm_kernel(%arg0: i32, %arg1: memref<36x128xf32, #tpu.memory_space<vmem>>, %arg2: memref<32x36xf32, #tpu.memory_space<vmem>>, %arg3: memref<32x1xf32, #tpu.memory_space<vmem>>, %arg4: memref<32x128xf32, #tpu.memory_space<vmem>>) attributes {dimension_semantics = [#tpu.dimension_semantics<parallel>], iteration_bounds = array<i64: 1>, scalar_prefetch = 0 : i64, scratch_operands = 0 : i64, tpu.core_type = #tpu.core_type<tc>, window_params = [{transform_indices = @transform_0, window_bounds = array<i64: 36, 128>}, {pipeline_mode = #tpu.pipeline_mode<synchronous>, transform_indices = @transform_1, window_bounds = array<i64: 32, 36>}, {pipeline_mode = #tpu.pipeline_mode<synchronous>, transform_indices = @transform_2, window_bounds = array<i64: 32, 1>}, {transform_indices = @transform_3, window_bounds = array<i64: 32, 128>}]} {
    %c0 = arith.constant 0 : index
    %c0_0 = arith.constant 0 : index
    %0 = vector.load %arg2[%c0, %c0_0] : memref<32x36xf32, #tpu.memory_space<vmem>>, vector<32x36xf32>
    %c0_1 = arith.constant 0 : index
    %c0_2 = arith.constant 0 : index
    %1 = vector.load %arg1[%c0_1, %c0_2] : memref<36x128xf32, #tpu.memory_space<vmem>>, vector<36x128xf32>
    %cst = arith.constant dense<0.000000e+00> : vector<32x128xf32>
    %2 = tpu.matmul %0, %1, %cst {dimension_numbers = #tpu.dot_dimension_numbers<[1], [0], [0], [1], [0, 0, 1, 1], [], []>} : vector<32x36xf32>, vector<36x128xf32>, vector<32x128xf32> -> vector<32x128xf32>
    %c0_3 = arith.constant 0 : index
    %c0_4 = arith.constant 0 : index
    %3 = vector.load %arg3[%c0_3, %c0_4] : memref<32x1xf32, #tpu.memory_space<vmem>>, vector<32x1xf32>
    %4 = vector.broadcast %3 : vector<32x1xf32> to vector<32x128xf32>
    %5 = arith.addf %2, %4 : vector<32x128xf32>
    %cst_5 = arith.constant 0.000000e+00 : f32
    %6 = vector.broadcast %cst_5 : f32 to vector<32x128xf32>
    %7 = arith.maximumf %5, %6 : vector<32x128xf32>
    %c0_6 = arith.constant 0 : index
    %c0_7 = arith.constant 0 : index
    %8 = vector.load %arg4[%c0_6, %c0_7] : memref<32x128xf32, #tpu.memory_space<vmem>>, vector<32x128xf32>
    tpu.vector_store %arg4[%c0_6, %c0_7], %7 {strides = array<i32>} : memref<32x128xf32, #tpu.memory_space<vmem>>, vector<32x128xf32>,
    return
  }
  func.func @transform_0(%arg0: i32) -> (i32, i32) {
    %c0_i32 = arith.constant 0 : i32
    %c0_i32_0 = arith.constant 0 : i32
    return %c0_i32, %arg0 : i32, i32
  }
  func.func @transform_1(%arg0: i32) -> (i32, i32) {
    %c0_i32 = arith.constant 0 : i32
    %c0_i32_0 = arith.constant 0 : i32
    %c0_i32_1 = arith.constant 0 : i32
    return %c0_i32, %c0_i32_0 : i32, i32
  }
  func.func @transform_2(%arg0: i32) -> (i32, i32) {
    %c0_i32 = arith.constant 0 : i32
    %c0_i32_0 = arith.constant 0 : i32
    %c0_i32_1 = arith.constant 0 : i32
    return %c0_i32, %c0_i32_0 : i32, i32
  }
  func.func @transform_3(%arg0: i32) -> (i32, i32) {
    %c0_i32 = arith.constant 0 : i32
    %c0_i32_0 = arith.constant 0 : i32
    return %c0_i32, %arg0 : i32, i32
  }
}

</mosaic_0001>

<bundles_post_ra>
// kernel: tpu_custom_call.1
= control target key start
LH: loop header
LB: loop body
LE: loop exit
PB: predicated region body
PF: predicated region fallthrough
CT: control target
= control target key end

     0   :  { %8 = vsyncpa [#allocation3], 0  ;;  %s341_s0 = inlined_call_operand.hbm [shape: f32[36,128], index: 0, kind: input, shape index: {}]   ;;  %s342_s1 = inlined_call_operand.vmem [shape: f32[32,36], index: 1, kind: input, shape index: {}]   ;;  %s343_s2 = inlined_call_operand.vmem [shape: f32[32,1], index: 2, kind: input, shape index: {}]   ;;  %s344_s3 = inlined_call_operand.hbm [shape: f32[32,128], index: 3, kind: output, shape index: {}]  }
   0x1   :  { %9 = vsyncpa [#allocation4], 0  ;;  %s280_s12 = smov [#allocation2]  }
   0x2   :  { %s15_s13 = sshll.u32 %s280_s12, 4  ;;  %s16_s13 = int_to_ptr.vmem [resolvable:$true] %s15_s13 }
   0x3   :  { %s244_s14 = scalar_lea.vmem %s16_s13, 640  ;;  %p249_p1 = scmp.lt.s32.totalorder %s16_s13, %s16_s13 }
   0x4   :  { %p245_p0 = scmp.ne.s32.totalorder %s16_s13, %s244_s14  ;;  %p250_p2 = scmp.lt.s32.totalorder %s244_s14, %s244_s14 }
   0x6   :  { %p251_p3 = por %p250_p2, %p249_p1 }
   0x8   :  { %p252_p4 = pnand %p251_p3, %p245_p0 }
   0xa   :  { %255 = shalt.err (!%p252_p4)
}
   0xb   :  { %s281_s15 = smov 128   ;;  %s282_s16 = smov 8  }
   0xc   :  { %21 = dma.hbm_to_vmem [thread:$0]  %s341_s0, 640, %s16_s13, [#allocation3], %s281_s15, %s281_s15, %s282_s16  }
   0xd   :  { %276 = dma.done.wait [#allocation3], 640  }
   0xe   :  { %277 = vsyncadd [#allocation3], 4294966656  ;;  %v283_v0 = vmov 0   ;;  %vm75_vm0 = vcmask 1043456   ;;  %v37_v1 = vld [vmem:[#allocation2 + $0x20] sm:$0xf] }
   0xf   :  { %235 = vset.pattern.permute.xlu1 %v283_v0  ;;  %234 = vset.pattern.permute.xlu0 %v283_v0  ;;  %v36_v2 = vld [vmem:[#allocation2 + $0x18] sm:$0xff]  ;;  %v35_v3 = vld [vmem:[#allocation2 + $0x10] sm:$0xff]  ;;  %v34_v4 = vld [vmem:[#allocation2 + $0x8] sm:$0xff]  ;;  %vm62_vm1 = vcmask 293888   ;;  %s284_s6 = smov [#allocation5]  }
  0x10   :  { %203 = vmatprep.subr.msk.mxu0 %vm75_vm0, %v37_v1  ;;  %219 = vmatprep.subr.msk.mxu1 %vm75_vm0, %v37_v1  ;;  %v33_v5 = vld [vmem:[#allocation2] sm:$0xff]  ;;  %v31_v7 = vld [vmem:[%s342_s1 + $0x10] sm:$0xff]  ;;  %v30_v8 = vld [vmem:[%s342_s1 + $0x8] sm:$0xff]  ;;  %s177_s7 = sshll.u32 %s284_s6, 4  ;;  %s178_s7 = int_to_ptr.vmem [resolvable:$true] %s177_s7 }
  0x11   :  { %204 = vmatpush3.msk.msra.mxu0 %vm75_vm0, %v37_v1  ;;  %224 = vmatpush3.msk.msra.mxu1 %vm75_vm0, %v37_v1  ;;  %v29_v6 = vld [vmem:[%s342_s1] sm:$0xff]  ;;  %v32_v9 = vld [vmem:[%s342_s1 + $0x18] sm:$0xff]  ;;  %v40_v10 = vld [vmem:[%s343_s2 + $0x10] sm:$0xff]  ;;  %p261_p6 = scmp.lt.s32.totalorder %s178_s7, %s178_s7 }
  0x12   :  { %205 = vmatprep.subr.mxu0 %v36_v2  ;;  %220 = vmatprep.subr.mxu1 %v36_v2  ;;  %v38_v11 = vld [vmem:[%s343_s2] sm:$0xff]  ;;  %v41_v12 = vld [vmem:[%s343_s2 + $0x18] sm:$0xff]  ;;  %v39_v13 = vld [vmem:[%s343_s2 + $0x8] sm:$0xff]  ;;  %s256_s2 = scalar_lea.vmem %s178_s7, 512 }
  0x13   :  { %206 = vmatpush3.msra.mxu0 %v36_v2  ;;  %225 = vmatpush3.msra.mxu1 %v36_v2  ;;  %p257_p5 = scmp.ne.s32.totalorder %s178_s7, %s256_s2  ;;  %p262_p7 = scmp.lt.s32.totalorder %s256_s2, %s256_s2 }
  0x14   :  { %207 = vmatprep.subr.mxu0 %v35_v3  ;;  %221 = vmatprep.subr.mxu1 %v35_v3 }
  0x15   :  { %208 = vmatpush3.msra.mxu0 %v35_v3  ;;  %226 = vmatpush3.msra.mxu1 %v35_v3  ;;  %p263_p8 = por %p262_p7, %p261_p6 }
  0x16   :  { %209 = vmatprep.subr.mxu0 %v34_v4  ;;  %222 = vmatprep.subr.mxu1 %v34_v4 }
  0x17   :  { %210 = vmatpush3.msra.mxu0 %v34_v4  ;;  %227 = vmatpush3.msra.mxu1 %v34_v4  ;;  %p264_p9 = pnand %p263_p8, %p257_p5 }
  0x18   :  { %211 = vmatprep.subr.mxu0 %v33_v5  ;;  %223 = vmatprep.subr.mxu1 %v33_v5 }
  0x19   :  { %212 = vmatpush3.msra.mxu0 %v33_v5  ;;  %228 = vmatpush3.msra.mxu1 %v33_v5 }
  0x1a   :  { %213 = vmatprep.mubr.msk.f32.mxu0 %vm62_vm1, %v29_v6  ;;  %216 = vmatprep.mubr.msk.f32.mxu1 %vm62_vm1, %v31_v7 }
  0x1b   :  { %214 = vmatmul.mubr.msk.f32.vlgmr.msra.gmra.mxu0 %vm62_vm1, %v30_v8  ;;  %217 = vmatmul.mubr.msk.f32.vlgmr.msra.gmra.mxu1 %vm62_vm1, %v32_v9 }
  0x1c   :  { %54 = vperm.xlu1 %235, %v40_v10   ;;  %44 = vperm.xlu0 %234, %v38_v11  }
  0x20   :  { %59 = vperm.xlu1 %235, %v41_v12   ;;  %49 = vperm.xlu0 %234, %v39_v13  }
  0x97   :  { %v55_v14 = vpop.permute.xlu1 %54  ;;  %v45_v15 = vpop.permute.xlu0 %44 }
  0x9b   :  { %v60_v16 = vpop.permute.xlu1 %59  ;;  %v50_v17 = vpop.permute.xlu0 %49 }
  0xdb   :  { %v215_v18 = vpop.f32.mrf.mxu0  ;;  %v218_v19 = vpop.f32.mrf.mxu1 }
  0xdc   :  { %v151_v20 = vadd.f32 %v215_v18, %v50_v17  ;;  %v161_v21 = vadd.f32 %v218_v19, %v60_v16 }
  0xdd   :  { %v145_v22 = vpop.f32.mrf.mxu0  ;;  %v155_v23 = vpop.f32.mrf.mxu1 }
  0xde   :  { %v165_v24 = vmax.f32 %v151_v20, 0.0  ;;  %v167_v25 = vmax.f32 %v161_v21, 0.0  ;;  %v146_v26 = vadd.f32 %v145_v22, %v45_v15  ;;  %v156_v27 = vadd.f32 %v155_v23, %v55_v14 }
  0xe0   :  { %169 = vst [vmem:[#allocation5 + $0x8] sm:$0xff] %v165_v24  ;;  %171 = vst [vmem:[#allocation5 + $0x18] sm:$0xff] %v167_v25  ;;  %v164_v28 = vmax.f32 %v146_v26, 0.0  ;;  %v166_v29 = vmax.f32 %v156_v27, 0.0 }
  0xe2   :  { %168 = vst [vmem:[#allocation5] sm:$0xff] %v164_v28  ;;  %170 = vst [vmem:[#allocation5 + $0x10] sm:$0xff] %v166_v29 }
  0xe3   :  { %267 = shalt.err (!%p264_p9)
}
  0xe4   :  { %183 = dma.vmem_to_hbm [thread:$0]  %s178_s7, 512, %s344_s3, [#allocation4], %s281_s15, %s281_s15, %s282_s16  }
  0xe5   :  { %278 = dma.done.wait [#allocation4], 512  }
  0xe6   :  { %279 = vsyncadd [#allocation4], 4294966784 }
  0xe7   :  { %187 = vsyncpa [#allocation3], 1 }
  0xe8   :  { %188 = vsyncpa [#allocation4], 1 }

</bundles_post_ra>
